<compile_context>
chip_gen: v7x
topology: tpu7x:2x2x1
jax: 0.10.0
libtpu: 0.0.40
codegen_flags: <defaults>
</compile_context>

<pallas_src>
import jax
import jax.numpy as jnp
from jax import lax
from jax.experimental import pallas as pl
from jax.experimental.pallas import tpu as pltpu

HIDDEN_SIZE = 10
INPUT_SIZE = 10
NUM_CLASSES = 1
_F = HIDDEN_SIZE          # all layers padded to F x F / F x 1

_MIN_TB = 1024            # big enough to amortize per-step overhead
_MAX_TB = 8192            # keeps VMEM well under every chip's scoped default


def _round_up(n, m):
    return ((n + m - 1) // m) * m


def _mlp_kernel(w_ref, b_ref, x_ref, o_ref):
    # w_ref: [4, F, F]  layer-stacked, PyTorch [out, in] layout (w4 zero-padded)
    # b_ref: [4, F, 1]  layer-stacked (b4 zero-padded)
    # x_ref: [TB, F]    batch-major, exactly as stored in HBM
    # o_ref: [1, TB]    lane-dense output row
    x = x_ref[...]

    # fc1: contract x's feature axis with W1's in-features axis -> [F, TB]
    # (feature-major; batch lives in the lane axis from here on).
    h = lax.dot_general(
        w_ref[0], x,
        dimension_numbers=(((1,), (1,)), ((), ())),
        preferred_element_type=jnp.float32) + b_ref[0]
    h = jnp.maximum(h, 0.0)

    h = jnp.dot(w_ref[1], h, preferred_element_type=jnp.float32) + b_ref[1]
    h = jnp.maximum(h, 0.0)

    h = jnp.dot(w_ref[2], h, preferred_element_type=jnp.float32) + b_ref[2]
    h = jnp.maximum(h, 0.0)

    # fc4: only row 0 of the padded [F, F] w4 is real -> slice before the matmul.
    out = jnp.dot(w_ref[3, 0:1, :], h,
                  preferred_element_type=jnp.float32) + b_ref[3, 0:1, :]
    o_ref[...] = out.astype(o_ref.dtype)


def _pack_params(params):
    """Pack per-layer weights/biases into single zero-padded slabs."""
    def pad_w(w):
        buf = jnp.zeros((_F, _F), jnp.float32)
        return buf.at[: w.shape[0], : w.shape[1]].set(w)

    def pad_b(b):
        buf = jnp.zeros((_F,), jnp.float32)
        return buf.at[: b.shape[0]].set(b)

    w_packed = jnp.stack([pad_w(params[f"w{i}"]) for i in range(1, 5)])   # [4,F,F]
    b_packed = jnp.stack([pad_b(params[f"b{i}"]) for i in range(1, 5)])   # [4,F]
    return w_packed, b_packed.reshape(4, _F, 1)                           # [4,F,1]


def _pick_block_b(B, block_b):
    """Batch tile: multiple of 128, in [1024, 8192], >= ~8 grid steps when B is
    large (keeps both v7x TCs busy), never wider than the 128-rounded batch."""
    if block_b is not None:
        tb = max(128, _round_up(int(block_b), 128))
    else:
        tb = _round_up(pl.cdiv(B, 8), 128)
        tb = max(_MIN_TB, min(_MAX_TB, tb))
    return min(tb, _round_up(B, 128))


def neural_net_forward(x, params, block_b=None):
    """x: [B, INPUT_SIZE] float32 (batch-major, PyTorch convention).
    params: dict of w1..w4 ([out, in]) and b1..b4 ([out])."""
    B = x.shape[0]
    tb = _pick_block_b(B, block_b)
    grid = (pl.cdiv(B, tb),)

    w_packed, b_packed = _pack_params(params)

    flops = 2 * B * (3 * _F * _F + _F * NUM_CLASSES)
    bytes_accessed = 4 * (B * INPUT_SIZE + B * NUM_CLASSES + 4 * _F * _F + 4 * _F)

    out = pl.pallas_call(
        _mlp_kernel,
        out_shape=jax.ShapeDtypeStruct((1, B), jnp.float32),
        grid_spec=pltpu.PrefetchScalarGridSpec(
            num_scalar_prefetch=0,
            grid=grid,
            in_specs=[
                # Weights / biases: same block every grid step -> VMEM-resident.
                pl.BlockSpec((4, _F, _F), lambda i: (0, 0, 0)),
                pl.BlockSpec((4, _F, 1), lambda i: (0, 0, 0)),
                # Batch-tiled, batch-major input (no host-side transpose/pad).
                pl.BlockSpec((tb, INPUT_SIZE), lambda i: (i, 0)),
            ],
            out_specs=pl.BlockSpec((1, tb), lambda i: (0, i)),
        ),
        compiler_params=pltpu.CompilerParams(
            dimension_semantics=("parallel",)),
        cost_estimate=pl.CostEstimate(
            flops=flops, transcendentals=0, bytes_accessed=bytes_accessed),
    )(w_packed, b_packed, x.astype(jnp.float32))

    # Back to the PyTorch-shaped [B, NUM_CLASSES] output.
    return out[0, :].reshape(B, NUM_CLASSES)


def init_params(key):
    """Deterministic init mimicking nn.Linear's uniform(-1/sqrt(fan_in), +).
    Weights stored as [out_features, in_features] (PyTorch layout)."""
    dims = [(INPUT_SIZE, HIDDEN_SIZE),
            (HIDDEN_SIZE, HIDDEN_SIZE),
            (HIDDEN_SIZE, HIDDEN_SIZE),
            (HIDDEN_SIZE, NUM_CLASSES)]
    params = {}
    for i, (fan_in, fan_out) in enumerate(dims, start=1):
        key, kw, kb = jax.random.split(key, 3)
        bound = 1.0 / (fan_in ** 0.5)
        params[f"w{i}"] = jax.random.uniform(
            kw, (fan_out, fan_in), jnp.float32, minval=-bound, maxval=bound)
        params[f"b{i}"] = jax.random.uniform(
            kb, (fan_out,), jnp.float32, minval=-bound, maxval=bound)
    return params


def _reference_forward(x, params):
    h = jnp.maximum(x @ params["w1"].T + params["b1"], 0.0)
    h = jnp.maximum(h @ params["w2"].T + params["b2"], 0.0)
    h = jnp.maximum(h @ params["w3"].T + params["b3"], 0.0)
    return h @ params["w4"].T + params["b4"]


if __name__ == "__main__":
    key = jax.random.PRNGKey(0)
    params = init_params(key)

    # MinMaxScaler in the source maps features into [0, 1]; emulate with uniform.
    # Case 1: B=300 -> single grid step with a masked partial batch tile.
    key, kx1 = jax.random.split(key)
    x1 = jax.random.uniform(kx1, (300, INPUT_SIZE), jnp.float32)
    out1 = jax.block_until_ready(neural_net_forward(x1, params))
    ref1 = _reference_forward(x1, params)
    assert out1.shape == (300, NUM_CLASSES)
    assert jnp.allclose(out1, ref1, atol=1e-5, rtol=1e-5)

    # Case 2: B=2500 with a 1024-wide tile -> 3 grid steps incl. a partial one.
    key, kx2 = jax.random.split(key)
    x2 = jax.random.uniform(kx2, (2500, INPUT_SIZE), jnp.float32)
    out2 = jax.block_until_ready(neural_net_forward(x2, params, block_b=1024))
    ref2 = _reference_forward(x2, params)
    assert out2.shape == (2500, NUM_CLASSES)
    assert jnp.allclose(out2, ref2, atol=1e-5, rtol=1e-5)

    print("KERNEL_OK")
</pallas_src>

<mosaic_0001>
module attributes {stable_mosaic.version = 11 : i64} {
  func.func @_mlp_kernel(%arg0: i32, %arg1: memref<4x10x10xf32, #tpu.memory_space<vmem>>, %arg2: memref<4x10x1xf32, #tpu.memory_space<vmem>>, %arg3: memref<384x10xf32, #tpu.memory_space<vmem>>, %arg4: memref<1x384xf32, #tpu.memory_space<vmem>>) attributes {dimension_semantics = [#tpu.dimension_semantics<parallel>], iteration_bounds = array<i64: 1>, scalar_prefetch = 0 : i64, scratch_operands = 0 : i64, tpu.core_type = #tpu.core_type<tc>, window_params = [{pipeline_mode = #tpu.pipeline_mode<synchronous>, transform_indices = @transform_0, window_bounds = array<i64: 4, 10, 10>}, {pipeline_mode = #tpu.pipeline_mode<synchronous>, transform_indices = @transform_1, window_bounds = array<i64: 4, 10, 1>}, {transform_indices = @transform_2, window_bounds = array<i64: 384, 10>}, {transform_indices = @transform_3, window_bounds = array<i64: 1, 384>}]} {
    %c0 = arith.constant 0 : index
    %c0_0 = arith.constant 0 : index
    %0 = vector.load %arg3[%c0, %c0_0] : memref<384x10xf32, #tpu.memory_space<vmem>>, vector<384x10xf32>
    %c0_1 = arith.constant 0 : index
    %c0_2 = arith.constant 0 : index
    %c0_3 = arith.constant 0 : index
    %1 = vector.load %arg1[%c0_1, %c0_2, %c0_3] : memref<4x10x10xf32, #tpu.memory_space<vmem>>, vector<1x10x10xf32>
    %2 = vector.shape_cast %1 : vector<1x10x10xf32> to vector<10x10xf32>
    %cst = arith.constant dense<0.000000e+00> : vector<10x384xf32>
    %3 = tpu.matmul %2, %0, %cst {dimension_numbers = #tpu.dot_dimension_numbers<[1], [1], [0], [0], [0, 0, 1, 0], [], []>} : vector<10x10xf32>, vector<384x10xf32>, vector<10x384xf32> -> vector<10x384xf32>
    %c0_4 = arith.constant 0 : index
    %c0_5 = arith.constant 0 : index
    %c0_6 = arith.constant 0 : index
    %4 = vector.load %arg2[%c0_4, %c0_5, %c0_6] : memref<4x10x1xf32, #tpu.memory_space<vmem>>, vector<1x10x1xf32>
    %5 = vector.shape_cast %4 : vector<1x10x1xf32> to vector<10x1xf32>
    %6 = vector.broadcast %5 : vector<10x1xf32> to vector<10x384xf32>
    %7 = arith.addf %3, %6 : vector<10x384xf32>
    %cst_7 = arith.constant 0.000000e+00 : f32
    %8 = vector.broadcast %cst_7 : f32 to vector<10x384xf32>
    %9 = arith.maximumf %7, %8 : vector<10x384xf32>
    %c1 = arith.constant 1 : index
    %c0_8 = arith.constant 0 : index
    %c0_9 = arith.constant 0 : index
    %10 = vector.load %arg1[%c1, %c0_8, %c0_9] : memref<4x10x10xf32, #tpu.memory_space<vmem>>, vector<1x10x10xf32>
    %11 = vector.shape_cast %10 : vector<1x10x10xf32> to vector<10x10xf32>
    %cst_10 = arith.constant dense<0.000000e+00> : vector<10x384xf32>
    %12 = tpu.matmul %11, %9, %cst_10 {dimension_numbers = #tpu.dot_dimension_numbers<[1], [0], [0], [1], [0, 0, 1, 1], [], []>} : vector<10x10xf32>, vector<10x384xf32>, vector<10x384xf32> -> vector<10x384xf32>
    %c1_11 = arith.constant 1 : index
    %c0_12 = arith.constant 0 : index
    %c0_13 = arith.constant 0 : index
    %13 = vector.load %arg2[%c1_11, %c0_12, %c0_13] : memref<4x10x1xf32, #tpu.memory_space<vmem>>, vector<1x10x1xf32>
    %14 = vector.shape_cast %13 : vector<1x10x1xf32> to vector<10x1xf32>
    %15 = vector.broadcast %14 : vector<10x1xf32> to vector<10x384xf32>
    %16 = arith.addf %12, %15 : vector<10x384xf32>
    %cst_14 = arith.constant 0.000000e+00 : f32
    %17 = vector.broadcast %cst_14 : f32 to vector<10x384xf32>
    %18 = arith.maximumf %16, %17 : vector<10x384xf32>
    %c2 = arith.constant 2 : index
    %c0_15 = arith.constant 0 : index
    %c0_16 = arith.constant 0 : index
    %19 = vector.load %arg1[%c2, %c0_15, %c0_16] : memref<4x10x10xf32, #tpu.memory_space<vmem>>, vector<1x10x10xf32>
    %20 = vector.shape_cast %19 : vector<1x10x10xf32> to vector<10x10xf32>
    %cst_17 = arith.constant dense<0.000000e+00> : vector<10x384xf32>
    %21 = tpu.matmul %20, %18, %cst_17 {dimension_numbers = #tpu.dot_dimension_numbers<[1], [0], [0], [1], [0, 0, 1, 1], [], []>} : vector<10x10xf32>, vector<10x384xf32>, vector<10x384xf32> -> vector<10x384xf32>
    %c2_18 = arith.constant 2 : index
    %c0_19 = arith.constant 0 : index
    %c0_20 = arith.constant 0 : index
    %22 = vector.load %arg2[%c2_18, %c0_19, %c0_20] : memref<4x10x1xf32, #tpu.memory_space<vmem>>, vector<1x10x1xf32>
    %23 = vector.shape_cast %22 : vector<1x10x1xf32> to vector<10x1xf32>
    %24 = vector.broadcast %23 : vector<10x1xf32> to vector<10x384xf32>
    %25 = arith.addf %21, %24 : vector<10x384xf32>
    %cst_21 = arith.constant 0.000000e+00 : f32
    %26 = vector.broadcast %cst_21 : f32 to vector<10x384xf32>
    %27 = arith.maximumf %25, %26 : vector<10x384xf32>
    %c3 = arith.constant 3 : index
    %c0_22 = arith.constant 0 : index
    %c0_23 = arith.constant 0 : index
    %28 = vector.load %arg1[%c3, %c0_22, %c0_23] : memref<4x10x10xf32, #tpu.memory_space<vmem>>, vector<1x1x10xf32>
    %29 = vector.shape_cast %28 : vector<1x1x10xf32> to vector<1x10xf32>
    %cst_24 = arith.constant dense<0.000000e+00> : vector<1x384xf32>
    %30 = tpu.matmul %29, %27, %cst_24 {dimension_numbers = #tpu.dot_dimension_numbers<[1], [0], [0], [1], [0, 0, 1, 1], [], []>} : vector<1x10xf32>, vector<10x384xf32>, vector<1x384xf32> -> vector<1x384xf32>
    %c3_25 = arith.constant 3 : index
    %c0_26 = arith.constant 0 : index
    %c0_27 = arith.constant 0 : index
    %31 = vector.load %arg2[%c3_25, %c0_26, %c0_27] : memref<4x10x1xf32, #tpu.memory_space<vmem>>, vector<1x1x1xf32>
    %32 = vector.shape_cast %31 : vector<1x1x1xf32> to vector<1x1xf32>
    %33 = vector.broadcast %32 : vector<1x1xf32> to vector<1x384xf32>
    %34 = arith.addf %30, %33 : vector<1x384xf32>
    %c0_28 = arith.constant 0 : index
    %c0_29 = arith.constant 0 : index
    %35 = vector.load %arg4[%c0_28, %c0_29] : memref<1x384xf32, #tpu.memory_space<vmem>>, vector<1x384xf32>
    tpu.vector_store %arg4[%c0_28, %c0_29], %34 {strides = array<i32>} : memref<1x384xf32, #tpu.memory_space<vmem>>, vector<1x384xf32>,
    return
  }
  func.func @transform_0(%arg0: i32) -> (i32, i32, i32) {
    %c0_i32 = arith.constant 0 : i32
    %c0_i32_0 = arith.constant 0 : i32
    %c0_i32_1 = arith.constant 0 : i32
    %c0_i32_2 = arith.constant 0 : i32
    return %c0_i32, %c0_i32_0, %c0_i32_1 : i32, i32, i32
  }
  func.func @transform_1(%arg0: i32) -> (i32, i32, i32) {
    %c0_i32 = arith.constant 0 : i32
    %c0_i32_0 = arith.constant 0 : i32
    %c0_i32_1 = arith.constant 0 : i32
    %c0_i32_2 = arith.constant 0 : i32
    return %c0_i32, %c0_i32_0, %c0_i32_1 : i32, i32, i32
  }
  func.func @transform_2(%arg0: i32) -> (i32, i32) {
    %c0_i32 = arith.constant 0 : i32
    %c0_i32_0 = arith.constant 0 : i32
    return %arg0, %c0_i32 : i32, i32
  }
  func.func @transform_3(%arg0: i32) -> (i32, i32) {
    %c0_i32 = arith.constant 0 : i32
    %c0_i32_0 = arith.constant 0 : i32
    return %c0_i32, %arg0 : i32, i32
  }
}

</mosaic_0001>

<bundles_post_ra>
// kernel: tpu_custom_call.1
= control target key start
LH: loop header
LB: loop body
LE: loop exit
PB: predicated region body
PF: predicated region fallthrough
CT: control target
= control target key end

     0   :  { %vm77_vm0 = vcmask 80896   ;;  %v1338_v7 = vmov 0   ;;  %s1686_s0 = inlined_call_operand.vmem [shape: f32[4,10,10], index: 0, kind: input, shape index: {}]   ;;  %s1687_s1 = inlined_call_operand.vmem [shape: f32[4,10,1], index: 1, kind: input, shape index: {}]   ;;  %s1688_s2 = inlined_call_operand.vmem [shape: f32[300,10], index: 2, kind: input, shape index: {}]   ;;  %s1689_s3 = inlined_call_operand.hbm [shape: f32[1,300], index: 3, kind: output, shape index: {}]  }
   0x1   :  { %v31_v0 = vld [vmem:[%s1688_s2 + $0x80] sm:$0xff]  ;;  %v32_v1 = vld [vmem:[%s1688_s2 + $0x88] sm:$0xff]  ;;  %vm1376_vm1 = vmpackc.low %vm77_vm0, %vm77_vm0  ;;  %1312 = vset.pattern.permute.xlu0 %v1338_v7  ;;  %1313 = vset.pattern.permute.xlu1 %v1338_v7 }
   0x2   :  { %v47_v2 = vld [vmem:[%s1688_s2 + $0x100] sm:$0xff]  ;;  %v1175_v3 = vpack.c.bf16 %v32_v1, %v31_v0  ;;  %v48_v5 = vld [vmem:[%s1688_s2 + $0x108] sm:$0xff]  ;;  %v33_v10 = vld [vmem:[%s1688_s2 + $0x90] sm:$0xff] }
   0x3   :  { %v15_v6 = vld [vmem:[%s1688_s2] sm:$0xff]  ;;  %v1223_v8 = vpack.c.bf16 %v48_v5, %v47_v2  ;;  %v16_v9 = vld [vmem:[%s1688_s2 + $0x8] sm:$0xff]  ;;  %v34_v11 = vld [vmem:[%s1688_s2 + $0x98] sm:$0xff] }
   0x4   :  { %1177 = vmatprep.subr.msk.bf16.mxu0 %vm1376_vm1, %v1175_v3  ;;  %v1178_v12 = vpack.c.bf16 %v16_v9, %v15_v6  ;;  %v1181_v13 = vpack.c.bf16 %v34_v11, %v33_v10  ;;  %v49_v14 = vld [vmem:[%s1688_s2 + $0x110] sm:$0xff]  ;;  %v50_v15 = vld [vmem:[%s1688_s2 + $0x118] sm:$0xff]  ;;  %v35_v19 = vld [vmem:[%s1688_s2 + $0xa0] sm:$0xff] }
   0x5   :  { %1225 = vmatprep.subr.msk.bf16.mxu1 %vm1376_vm1, %v1223_v8  ;;  %v1229_v16 = vpack.c.bf16 %v50_v15, %v49_v14  ;;  %v17_v17 = vld [vmem:[%s1688_s2 + $0x10] sm:$0xff]  ;;  %v18_v18 = vld [vmem:[%s1688_s2 + $0x18] sm:$0xff]  ;;  %v36_v20 = vld [vmem:[%s1688_s2 + $0xa8] sm:$0xff] }
   0x6   :  { %1180 = vmatpush3.bf16.xpose.msk.msra.mxu0 %vm1376_vm1, %v1178_v12  ;;  %1228 = vmatpush3.bf16.xpose.msk.msra.mxu1 %vm1376_vm1, %v1223_v8  ;;  %v51_v21 = vld [vmem:[%s1688_s2 + $0x120] sm:$0xff]  ;;  %v52_v22 = vld [vmem:[%s1688_s2 + $0x128] sm:$0xff]  ;;  %v1184_v23 = vpack.c.bf16 %v18_v18, %v17_v17  ;;  %v1187_v24 = vpack.c.bf16 %v36_v20, %v35_v19  ;;  %v37_v28 = vld [vmem:[%s1688_s2 + $0xb0] sm:$0xff] }
   0x7   :  { %1183 = vmatprep.subr.msk.bf16.mxu0 %vm1376_vm1, %v1181_v13  ;;  %1231 = vmatprep.subr.msk.bf16.mxu1 %vm1376_vm1, %v1229_v16  ;;  %v1235_v25 = vpack.c.bf16 %v52_v22, %v51_v21  ;;  %v19_v26 = vld [vmem:[%s1688_s2 + $0x20] sm:$0xff]  ;;  %v20_v27 = vld [vmem:[%s1688_s2 + $0x28] sm:$0xff]  ;;  %v38_v29 = vld [vmem:[%s1688_s2 + $0xb8] sm:$0xff] }
   0x8   :  { %v53_v30 = vld [vmem:[%s1688_s2 + $0x130] sm:$0xff]  ;;  %v54_v31 = vld [vmem:[%s1688_s2 + $0x138] sm:$0xff]  ;;  %v1460_v32 = vld [vmem:[%s1686_s0] sm:$0xff]  ;;  %v1190_v33 = vpack.c.bf16 %v20_v27, %v19_v26  ;;  %v1193_v35 = vpack.c.bf16 %v38_v29, %v37_v28 }
   0x9   :  { %1086 = vmatprep.mubr.msk.f32.mxu0 %vm77_vm0, %v1460_v32  ;;  %1151 = vmatprep.mubr.msk.f32.mxu1 %vm77_vm0, %v1460_v32  ;;  %v65_v34 = vld [vmem:[%s1687_s1] sm:$0xff]  ;;  %v1241_v36 = vpack.c.bf16 %v54_v31, %v53_v30 }
   0xa   :  { %69 = vperm.xlu0 %1312, %v65_v34  }
   0xe   :  { %1186 = vmatpush3.bf16.xpose.msk.msra.mxu0 %vm1376_vm1, %v1184_v23  ;;  %1234 = vmatpush3.bf16.xpose.msk.msra.mxu1 %vm1376_vm1, %v1229_v16 }
   0xf   :  { %1189 = vmatprep.subr.msk.bf16.mxu0 %vm1376_vm1, %v1187_v24  ;;  %1237 = vmatprep.subr.msk.bf16.mxu1 %vm1376_vm1, %v1235_v25 }
  0x10   :  { %8 = vsyncpa [#allocation3], 0  ;;  %v66_v37 = vld [vmem:[%s1687_s1 + $0x8] sm:$0x3]  ;;  %v21_v38 = vld [vmem:[%s1688_s2 + $0x30] sm:$0xff]  ;;  %v1339_v4 = vmov 0.0  }
  0x11   :  { %v22_v39 = vld [vmem:[%s1688_s2 + $0x38] sm:$0xff]  ;;  %v39_v40 = vld [vmem:[%s1688_s2 + $0xc0] sm:$0xff]  ;;  %v40_v41 = vld [vmem:[%s1688_s2 + $0xc8] sm:$0xff]  ;;  %74 = vperm.xlu0 %1312, %v66_v37   ;;  %vm408_vm2 = vcmask 1041408   ;;  %vm1340_vm3 = vmmov 1   ;;  %vm1342_vm5 = vmmov 0  }
  0x12   :  { %v55_v42 = vld [vmem:[%s1688_s2 + $0x140] sm:$0xff]  ;;  %v56_v43 = vld [vmem:[%s1688_s2 + $0x148] sm:$0xff]  ;;  %v1196_v45 = vpack.c.bf16 %v22_v39, %v21_v38  ;;  %v1199_v46 = vpack.c.bf16 %v40_v41, %v39_v40  ;;  %v1048_v48 = vld [vmem:[%s1687_s1 + $0x30] sm:$0x1] }
  0x13   :  { %v1038_v44 = vld [vmem:[%s1687_s1 + $0x20] sm:$0xff]  ;;  %v1247_v47 = vpack.c.bf16 %v56_v43, %v55_v42  ;;  %v24_v50 = vld [vmem:[%s1688_s2 + $0x48] sm:$0xff]  ;;  %v41_v51 = vld [vmem:[%s1688_s2 + $0xd0] sm:$0xff] }
  0x14   :  { %v23_v49 = vld [vmem:[%s1688_s2 + $0x40] sm:$0xff]  ;;  %v42_v52 = vld [vmem:[%s1688_s2 + $0xd8] sm:$0xff]  ;;  %v57_v53 = vld [vmem:[%s1688_s2 + $0x150] sm:$0xff] }
  0x15   :  { %584 = vperm.xlu0 %1312, %v1038_v44   ;;  %v58_v54 = vld [vmem:[%s1688_s2 + $0x158] sm:$0xff]  ;;  %v1202_v55 = vpack.c.bf16 %v24_v50, %v23_v49  ;;  %v1205_v56 = vpack.c.bf16 %v42_v52, %v41_v51  ;;  %v25_v58 = vld [vmem:[%s1688_s2 + $0x50] sm:$0xff]  ;;  %v43_v60 = vld [vmem:[%s1688_s2 + $0xe0] sm:$0xff] }
  0x16   :  { %1192 = vmatpush3.bf16.xpose.msk.msra.mxu0 %vm1376_vm1, %v1190_v33  ;;  %1240 = vmatpush3.bf16.xpose.msk.msra.mxu1 %vm1376_vm1, %v1235_v25  ;;  %v1253_v57 = vpack.c.bf16 %v58_v54, %v57_v53  ;;  %v26_v59 = vld [vmem:[%s1688_s2 + $0x58] sm:$0xff]  ;;  %v44_v61 = vld [vmem:[%s1688_s2 + $0xe8] sm:$0xff]  ;;  %v59_v62 = vld [vmem:[%s1688_s2 + $0x160] sm:$0xff] }
  0x17   :  { %1195 = vmatprep.subr.msk.bf16.mxu0 %vm1376_vm1, %v1193_v35  ;;  %1243 = vmatprep.subr.msk.bf16.mxu1 %vm1376_vm1, %v1241_v36  ;;  %v60_v63 = vld [vmem:[%s1688_s2 + $0x168] sm:$0xff]  ;;  %v1208_v0 = vpack.c.bf16 %v26_v59, %v25_v58  ;;  %v1211_v1 = vpack.c.bf16 %v44_v61, %v43_v60  ;;  %v27_v3 = vld [vmem:[%s1688_s2 + $0x60] sm:$0xff]  ;;  %v45_v6 = vld [vmem:[%s1688_s2 + $0xf0] sm:$0xff] }
  0x18   :  { %v1259_v2 = vpack.c.bf16 %v60_v63, %v59_v62  ;;  %v28_v5 = vld [vmem:[%s1688_s2 + $0x68] sm:$0xff]  ;;  %v46_v7 = vld [vmem:[%s1688_s2 + $0xf8] sm:$0xff]  ;;  %v61_v8 = vld [vmem:[%s1688_s2 + $0x170] sm:$0xff] }
  0x19   :  { %771 = vperm.xlu0 %1312, %v1048_v48   ;;  %v62_v9 = vld [vmem:[%s1688_s2 + $0x178] sm:$0xff]  ;;  %v1214_v10 = vpack.c.bf16 %v28_v5, %v27_v3  ;;  %v1217_v11 = vpack.c.bf16 %v46_v7, %v45_v6  ;;  %v29_v13 = vld [vmem:[%s1688_s2 + $0x70] sm:$0xff]  ;;  %v64_v16 = vld [vmem:[%s1686_s0 + $0x8] sm:$0x3] }
  0x1a   :  { %v1265_v12 = vpack.c.bf16 %v62_v9, %v61_v8  ;;  %v30_v14 = vld [vmem:[%s1688_s2 + $0x78] sm:$0xff]  ;;  %v1025_v17 = vld [vmem:[%s1686_s0 + $0x10] sm:$0xff]  ;;  %v1039_v20 = vld [vmem:[%s1687_s1 + $0x28] sm:$0x3]  ;;  %v1341_v8 = vmov 0.0|0.0  }
  0x1b   :  { %v1220_v15 = vpack.c.bf16 %v30_v14, %v29_v13  ;;  %v1027_v18 = vld [vmem:[%s1687_s1 + $0x10] sm:$0xff]  ;;  %v1028_v19 = vld [vmem:[%s1687_s1 + $0x18] sm:$0x3]  ;;  %vm1622_vm4 = vmpackc.low %vm408_vm2, %vm1340_vm3 }
  0x1c   :  { %394 = vperm.xlu1 %1313, %v1027_v18   ;;  %v1026_v44 = vld [vmem:[%s1686_s0 + $0x18] sm:$0x3]  ;;  %v1037_v63 = vld [vmem:[%s1686_s0 + $0x28] sm:$0x3] }
  0x1e   :  { %1198 = vmatpush3.bf16.xpose.msk.msra.mxu0 %vm1376_vm1, %v1196_v45  ;;  %1246 = vmatpush3.bf16.xpose.msk.msra.mxu1 %vm1376_vm1, %v1241_v36 }
  0x1f   :  { %1201 = vmatprep.subr.msk.bf16.mxu0 %vm1376_vm1, %v1199_v46  ;;  %1249 = vmatprep.subr.msk.bf16.mxu1 %vm1376_vm1, %v1247_v47  ;;  %v1036_v46 = vld [vmem:[%s1686_s0 + $0x20] sm:$0xff] }
  0x20   :  { %399 = vperm.xlu1 %1313, %v1028_v19   ;;  %v1047_v19 = vld [vmem:[%s1686_s0 + $0x30] sm:$0x1]  ;;  %s1344_s0 = smov [#allocation2]  }
  0x21   :  { %s965_s26 = sshll.u32 %s1344_s0, 4  ;;  %s966_s26 = int_to_ptr.vmem [resolvable:$true] %s965_s26 }
  0x22   :  { %s1314_s27 = scalar_lea.vmem %s966_s26, 48  ;;  %s1318_s28 = scalar_lea.vmem %s966_s26, 64 }
  0x23   :  { %p1315_p0 = scmp.ne.s32.totalorder %s966_s26, %s1314_s27  ;;  %p1319_p1 = scmp.lt.s32.totalorder %s966_s26, %s966_s26 }
  0x24   :  { %589 = vperm.xlu1 %1313, %v1039_v20   ;;  %p1320_p2 = scmp.lt.s32.totalorder %s1318_s28, %s1314_s27 }
  0x26   :  { %1204 = vmatpush3.bf16.xpose.msk.msra.mxu0 %vm1376_vm1, %v1202_v55  ;;  %1252 = vmatpush3.bf16.xpose.msk.msra.mxu1 %vm1376_vm1, %v1247_v47  ;;  %p1321_p3 = por %p1320_p2, %p1319_p1 }
  0x27   :  { %1207 = vmatprep.subr.msk.bf16.mxu0 %vm1376_vm1, %v1205_v56  ;;  %1255 = vmatprep.subr.msk.bf16.mxu1 %vm1376_vm1, %v1253_v57 }
  0x28   :  { %p1322_p4 = pnand %p1321_p3, %p1315_p0 }
  0x2e   :  { %1210 = vmatpush3.bf16.xpose.msk.msra.mxu0 %vm1376_vm1, %v1208_v0  ;;  %1258 = vmatpush3.bf16.xpose.msk.msra.mxu1 %vm1376_vm1, %v1253_v57 }
  0x2f   :  { %1213 = vmatprep.subr.msk.bf16.mxu0 %vm1376_vm1, %v1211_v1  ;;  %1261 = vmatprep.subr.msk.bf16.mxu1 %vm1376_vm1, %v1259_v2 }
  0x36   :  { %1216 = vmatpush3.bf16.xpose.msk.msra.mxu0 %vm1376_vm1, %v1214_v10  ;;  %1264 = vmatpush3.bf16.xpose.msk.msra.mxu1 %vm1376_vm1, %v1259_v2 }
  0x37   :  { %1219 = vmatprep.subr.msk.bf16.mxu0 %vm1376_vm1, %v1217_v11  ;;  %1267 = vmatprep.subr.msk.bf16.mxu1 %vm1376_vm1, %v1265_v12 }
  0x3e   :  { %1222 = vmatpush3.bf16.xpose.msk.msra.mxu0 %vm1376_vm1, %v1220_v15  ;;  %1270 = vmatpush3.bf16.xpose.msk.msra.mxu1 %vm1376_vm1, %v1265_v12 }
  0x45   :  { %1087 = vmatmul.mubr.msk.f32.vlgmr.msra.gmra.mrb[0].mxu0 %vm77_vm0, %v1460_v32  ;;  %1152 = vmatmul.mubr.msk.f32.vlgmr.msra.gmra.mrb[0].mxu1 %vm77_vm0, %v64_v16 }
  0x46   :  { %1088 = vmatprep.mubr.msk.f32.mxu0 %vm77_vm0, %v64_v16  ;;  %482 = vmatprep.mubr.f32.mxu1 %v1339_v4 }
  0x49   :  { %1089 = vmatmul.mubr.msk.f32.gmra.mrb[2].mxu0 %vm77_vm0, %v64_v16 }
  0x4a   :  { %1158 = vmatprep.mubr.msk.f32.mxu0 %vm77_vm0, %v1025_v17 }
  0x89   :  { %v70_v21 = vpop.permute.xlu0 %69 }
  0x90   :  { %v75_v22 = vpop.permute.xlu0 %74 }
  0x94   :  { %v585_v11 = vpop.permute.xlu0 %584 }
  0x9b   :  { %v395_v47 = vpop.permute.xlu1 %394 }
  0x9f   :  { %v400_v48 = vpop.permute.xlu1 %399 }
  0xa3   :  { %v590_v9 = vpop.permute.xlu1 %589 }
 0x118   :  { %v294_v23 = vpop.f32.mrb[0].mxu0  ;;  %v1153_v24 = vpop.f32.mrb[0].mxu1 }
 0x119   :  { %v377_v25 = vadd.f32 %v1153_v24, %v75_v22  ;;  %v296_v26 = vpop.f32.mrb[1].mxu0  ;;  %v371_v27 = vpop.f32.mrb[1].mxu1  ;;  %v295_v29 = vadd.f32 %v294_v23, %v70_v21 }
 0x11a   :  { %v372_v28 = vadd.f32 %v371_v27, %v70_v21  ;;  %v297_v31 = vadd.f32 %v296_v26, %v70_v21 }
 0x11b   :  { %v385_v30 = vmax.f32 %v377_v25, 0.0  ;;  %v380_v39 = vmax.f32 %v295_v29, 0.0 }
 0x11c   :  { %v382_v32 = vmax.f32 %v372_v28, 0.0  ;;  %v300_v33 = vpop.f32.mrb[2].mxu0  ;;  %v381_v41 = vmax.f32 %v297_v31, 0.0 }
 0x11d   :  { %v301_v34 = vadd.f32 %v300_v33, %v75_v22  ;;  %v302_v35 = vpop.f32.mrb[3].mxu0 }
 0x11e   :  { %v1277_v37 = vpack.c.bf16 %v385_v30, %v382_v32  ;;  %v303_v38 = vadd.f32 %v302_v35, %v75_v22 }
 0x11f   :  { %v383_v40 = vmax.f32 %v301_v34, 0.0  ;;  %v1343_v34 = vmov 1966171168  }
 0x120   :  { %v384_v42 = vmax.f32 %v303_v38, 0.0  ;;  %1279 = vmatprep.subr.msk.bf16.mxu0 %vm1622_vm4, %v1277_v37  ;;  %v932_v35 = vunpack.c.l.s4 %v1343_v34 }
 0x121   :  { %v1274_v43 = vpack.c.bf16 %v383_v40, %v380_v39  ;;  %1282 = vmatpush3.bf16.msk.msra.mxu0 %vm1622_vm4, %v1277_v37  ;;  %v934_v37 = vlaneseq  ;;  %v772_v40 = vpop.permute.xlu0 %771 }
 0x122   :  { %v1271_v45 = vpack.c.bf16 %v384_v42, %v381_v41  ;;  %v933_v38 = vunpack.c.0.s8 %v932_v35 }
 0x123   :  { %v935_v39 = vshrl.u32 %v934_v37, 7  ;;  %vm956_vm6 = vcmp.lt.s32.totalorder %v934_v37, 384 }
 0x124   :  { %1273 = vmatprep.subr.msk.bf16.mxu1 %vm1622_vm4, %v1271_v45  ;;  %1159 = vmatmul.mubr.msk.f32.vlgmr.msra.gmra.mrb[4].mxu0 %vm77_vm0, %v1026_v44 }
 0x125   :  { %1276 = vmatpush1.bf16.msk.msra.mxu1 %vm1622_vm4, %v1274_v43  ;;  %671 = vmatprep.mubr.f32.mxu0 %v1339_v4  ;;  %v936_v45 = vsub.s32 %v933_v38, %v935_v39 }
 0x128   :  { %1031 = vmatmul.mubr.msk.f32.vlgmr.msra.gmra.mrb[2].mxu1 %vm77_vm0, %v1025_v17 }
 0x129   :  { %488 = vmatprep.mubr.f32.mxu1 %v1339_v4 }
 0x12c   :  { %1032 = vmatmul.mubr.msk.f32.gmra.mrb[4].mxu1 %vm77_vm0, %v1026_v44 }
 0x12d   :  { %1165 = vmatprep.mubr.msk.f32.mxu1 %vm77_vm0, %v1036_v46 }
 0x1f7   :  { %v1160_v49 = vpop.f32.mrb[4].mxu0 }
 0x1f8   :  { %v567_v50 = vadd.f32 %v1160_v49, %v400_v48  ;;  %v561_v51 = vpop.f32.mrb[5].mxu0 }
 0x1f9   :  { %v562_v52 = vadd.f32 %v561_v51, %v395_v47 }
 0x1fa   :  { %v575_v53 = vmax.f32 %v567_v50, 0.0 }
 0x1fb   :  { %v572_v54 = vmax.f32 %v562_v52, 0.0  ;;  %v484_v55 = vpop.f32.mrb[2].mxu1 }
 0x1fc   :  { %v486_v56 = vpop.f32.mrb[3].mxu1  ;;  %v485_v58 = vadd.f32 %v484_v55, %v395_v47 }
 0x1fd   :  { %v1289_v57 = vpack.c.bf16 %v575_v53, %v572_v54  ;;  %v487_v59 = vadd.f32 %v486_v56, %v395_v47 }
 0x1fe   :  { %v570_v1 = vmax.f32 %v485_v58, 0.0 }
 0x1ff   :  { %v490_v60 = vpop.f32.mrb[4].mxu1  ;;  %1291 = vmatprep.subr.msk.bf16.mxu1 %vm1622_vm4, %v1289_v57  ;;  %v571_v3 = vmax.f32 %v487_v59, 0.0 }
 0x200   :  { %v491_v61 = vadd.f32 %v490_v60, %v400_v48  ;;  %v492_v62 = vpop.f32.mrb[5].mxu1  ;;  %1294 = vmatpush3.bf16.msk.msra.mxu1 %vm1622_vm4, %v1289_v57 }
 0x201   :  { %v493_v0 = vadd.f32 %v492_v62, %v400_v48 }
 0x202   :  { %v573_v2 = vmax.f32 %v491_v61, 0.0 }
 0x203   :  { %v574_v5 = vmax.f32 %v493_v0, 0.0  ;;  %1166 = vmatmul.mubr.msk.f32.vlgmr.msra.gmra.mrb[6].mxu1 %vm77_vm0, %v1037_v63 }
 0x204   :  { %v1286_v6 = vpack.c.bf16 %v573_v2, %v570_v1  ;;  %850 = vmatprep.mubr.f32.mxu1 %v1339_v4 }
 0x205   :  { %v1283_v7 = vpack.c.bf16 %v574_v5, %v571_v3 }
 0x207   :  { %1285 = vmatprep.subr.msk.bf16.mxu0 %vm1622_vm4, %v1283_v7 }
 0x208   :  { %1288 = vmatpush1.bf16.msk.msra.mxu0 %vm1622_vm4, %v1286_v6 }
 0x209   :  { %1301 = vmatprep.subr.bf16.mxu0 %v1341_v8 }
 0x20b   :  { %1042 = vmatmul.mubr.msk.f32.vlgmr.msra.gmra.mrb[6].mxu0 %vm77_vm0, %v1036_v46 }
 0x20c   :  { %677 = vmatprep.mubr.f32.mxu0 %v1339_v4 }
 0x20f   :  { %1043 = vmatmul.mubr.msk.f32.gmra.mrb[8].mxu0 %vm77_vm0, %v1037_v63 }
 0x210   :  { %1172 = vmatprep.mubr.msk.f32.mxu0 %vm1342_vm5, %v1339_v4 }
 0x2d6   :  { %v1167_v10 = vpop.f32.mrb[6].mxu1 }
 0x2d7   :  { %v756_v12 = vadd.f32 %v1167_v10, %v590_v9  ;;  %v750_v13 = vpop.f32.mrb[7].mxu1 }
 0x2d8   :  { %v751_v14 = vadd.f32 %v750_v13, %v585_v11 }
 0x2d9   :  { %v764_v15 = vmax.f32 %v756_v12, 0.0 }
 0x2da   :  { %v761_v16 = vmax.f32 %v751_v14, 0.0 }
 0x2dc   :  { %v1302_v17 = vpack.c.bf16 %v764_v15, %v761_v16 }
 0x2de   :  { %v673_v18 = vpop.f32.mrb[6].mxu0  ;;  %1304 = vmatpush3.bf16.msk.msra.mxu0 %vm1622_vm4, %v1302_v17 }
 0x2df   :  { %v675_v20 = vpop.f32.mrb[7].mxu0  ;;  %v674_v21 = vadd.f32 %v673_v18, %v585_v11 }
 0x2e0   :  { %v676_v4 = vadd.f32 %v675_v20, %v585_v11 }
 0x2e1   :  { %1173 = vmatmul.mubr.msk.f32.vlgmr.msra.gmra.mrb[10].mxu0 %vm77_vm0, %v1047_v19  ;;  %v759_v26 = vmax.f32 %v674_v21, 0.0 }
 0x2e2   :  { %v679_v22 = vpop.f32.mrb[8].mxu0  ;;  %v760_v28 = vmax.f32 %v676_v4, 0.0 }
 0x2e3   :  { %v680_v23 = vadd.f32 %v679_v22, %v590_v9  ;;  %v681_v24 = vpop.f32.mrb[9].mxu0 }
 0x2e4   :  { %v682_v25 = vadd.f32 %v681_v24, %v590_v9 }
 0x2e5   :  { %v762_v27 = vmax.f32 %v680_v23, 0.0 }
 0x2e6   :  { %v763_v29 = vmax.f32 %v682_v25, 0.0 }
 0x2e7   :  { %v1298_v30 = vpack.c.bf16 %v762_v27, %v759_v26 }
 0x2e8   :  { %v1295_v31 = vpack.c.bf16 %v763_v29, %v760_v28 }
 0x2ea   :  { %1297 = vmatprep.subr.msk.bf16.mxu1 %vm1622_vm4, %v1295_v31 }
 0x2eb   :  { %1300 = vmatpush1.bf16.msk.msra.mxu1 %vm1622_vm4, %v1298_v30 }
 0x2ee   :  { %1051 = vmatmul.mubr.msk.f32.vlgmr.msra.gmra.mrb[8].mxu1 %vm77_vm0, %v1047_v19 }
 0x3b4   :  { %v923_v32 = vpop.f32.mrb[10].mxu0 }
 0x3b5   :  { %v1174_v33 = vpop.f32.mrb[11].mxu0  ;;  %v924_v44 = vadd.f32 %v923_v32, %v772_v40 }
 0x3b7   :  { %v944_v48 = vrot.slane %v924_v44, %v936_v45 }
 0x3c1   :  { %v852_v41 = vpop.f32.mrb[8].mxu1 }
 0x3c2   :  { %v853_v42 = vadd.f32 %v852_v41, %v772_v40  ;;  %v854_v43 = vpop.f32.mrb[9].mxu1 }
 0x3c3   :  { %v855_v46 = vadd.f32 %v854_v43, %v772_v40 }
 0x3c5   :  { %v930_v47 = vcombine.low %v853_v42, %v855_v46 }
 0x3c7   :  { %v937_v36 = vrot.slane %v930_v47, %v936_v45 }
 0x3c9   :  { %v945_v49 = vcombine.low %v937_v36, %v944_v48 }
 0x3cb   :  { %v952_v50 = vrot.slane %v945_v49, %v936_v45 }
 0x3cd   :  { %958 = vst.msk [vmem:[#allocation2] sm:$0x7] %vm956_vm6, %v952_v50 }
 0x3ce   :  { %1325 = shalt.err (!%p1322_p4)
}
 0x3cf   :  { %s1326_s4 = scalar_lea.hbm %s1689_s3, 48 }
 0x3d0   :  { %p1327_p5 = scmp.ne.s32.totalorder %s1689_s3, %s1326_s4  ;;  %p1330_p6 = scmp.lt.u32.totalorder %s1326_s4, %s1689_s3 }
 0x3d2   :  { %p1332_p7 = pnand %p1330_p6, %p1327_p5 }
 0x3d4   :  { %1335 = shalt.err (!%p1332_p7)
}
 0x3d5   :  { %968 = dma.vmem_to_hbm [thread:$0]  %s966_s26, 48, %s1689_s3, [#allocation3]  }
 0x3d6   :  { %1336 = dma.done.wait [#allocation3], 48  }
 0x3d7   :  { %1337 = vsyncadd [#allocation3], 4294967248 }
 0x3d8   :  { %972 = vsyncpa [#allocation3], 1 }

</bundles_post_ra>
